<compile_context>
chip_gen: v7x
topology: tpu7x:2x2x1
jax: 0.10.0
libtpu: 0.0.40
codegen_flags: <defaults>
</compile_context>

<pallas_src>
import jax
import jax.numpy as jnp
from jax.experimental import pallas as pl
from jax.experimental.pallas import tpu as pltpu


def _conv1x1_pad1_leaky_kernel(x_ref, w_ref, b_ref, o_ref):
    # x_ref : (Nb, H, W)          VMEM  input images (channel dim squeezed)
    # w_ref : (Cout, 1)           VMEM  per-channel weight column
    # b_ref : (Cout, 1)           VMEM  per-channel bias column
    # o_ref : (Nb, Cout, Hp, Wp)  VMEM  padded NCHW output block
    nb, h, w = x_ref.shape
    _, cout, hp, wp = o_ref.shape

    wv = w_ref[...].reshape(1, cout, 1, 1)          # (1, Cout, 1, 1)
    bv = b_ref[...].reshape(1, cout, 1, 1)          # (1, Cout, 1, 1)

    # Border pixels see zero-padded input: v = b_c  ->  leaky(b_c).
    border = jnp.where(bv > 0, bv, bv * (-10.0))
    o_ref[...] = jnp.broadcast_to(border, (nb, cout, hp, wp))

    # Interior: v = w_c * x + b_c for all channels at once (VPU fma + select).
    v = x_ref[...][:, None, :, :] * wv + bv         # (Nb, Cout, H, W)
    o_ref[:, :, pl.ds(1, h), pl.ds(1, w)] = jnp.where(v > 0, v, v * (-10.0))


def _padded_tile_bytes(shape, itemsize=4):
    """VMEM footprint of a block after (8,128) tiling of the last two dims."""
    *lead, s, l = shape
    rows = ((s + 7) // 8) * 8
    lanes = ((l + 127) // 128) * 128
    total = rows * lanes * itemsize
    for d in lead:
        total *= d
    return total


def _pick_batch_block(n, per_elem_vmem_bytes, target_bytes=2 << 20):
    """Batch elements per grid step: ~target_bytes of VMEM per block, but keep
    at least 2 grid steps when N >= 2 (v7x has 2 TensorCores), and divide N."""
    nb = max(1, min(n, target_bytes // max(per_elem_vmem_bytes, 1)))
    if n >= 2:
        nb = min(nb, max(1, n // 2))
    while n % nb:
        nb -= 1
    return nb


def conv1x1_pad1_leaky(x_nchw, weight, bias):
    """x_nchw: (N, 1, H, W) f32, weight: (Cout, 1, 1, 1) f32, bias: (Cout,) f32.
       Returns (N, Cout, H+2, W+2) f32 == Conv2d(1, Cout, 1, padding=1) + where-leaky(-10)."""
    n, cin, h, w_ = x_nchw.shape
    assert cin == 1
    cout = int(weight.shape[0])
    hp, wp = h + 2, w_ + 2

    w_col = weight.reshape(cout, 1).astype(jnp.float32)
    b_col = bias.reshape(cout, 1).astype(jnp.float32)

    # Per-batch-element VMEM footprint (layout-inflated) -> batch block size.
    per_elem = (_padded_tile_bytes((1, h, w_)) +
                _padded_tile_bytes((1, cout, hp, wp)))
    nb = _pick_batch_block(n, per_elem)
    grid_n = n // nb

    # Scoped-VMEM budget: double-buffered in/out blocks + headroom, clamped to
    # stay within v7x's 64 MiB physical VMEM.
    block_bytes = nb * per_elem
    vmem_limit = int(min(64 << 20, max(16 << 20, 4 * block_bytes + (1 << 20))))

    return pl.pallas_call(
        _conv1x1_pad1_leaky_kernel,
        out_shape=jax.ShapeDtypeStruct((n, cout, hp, wp), jnp.float32),
        grid=(grid_n,),
        in_specs=[
            pl.BlockSpec((nb, None, h, w_), lambda i: (i, 0, 0, 0)),
            pl.BlockSpec((cout, 1), lambda i: (0, 0)),
            pl.BlockSpec((cout, 1), lambda i: (0, 0)),
        ],
        out_specs=pl.BlockSpec((nb, cout, hp, wp), lambda i: (i, 0, 0, 0)),
        compiler_params=pltpu.CompilerParams(
            dimension_semantics=("parallel",),
            vmem_limit_bytes=vmem_limit),
        cost_estimate=pl.CostEstimate(
            flops=3 * n * cout * hp * wp,
            transcendentals=0,
            bytes_accessed=4 * (n * h * w_ + n * cout * hp * wp + 4 * cout)),
    )(x_nchw, w_col, b_col)


if __name__ == "__main__":
    key = jax.random.PRNGKey(0)
    kx, kw, kb = jax.random.split(key, 3)

    # Module implies in_channels=1; small spatial size.
    x = jax.random.normal(kx, (2, 1, 16, 16), dtype=jnp.float32)
    weight = jax.random.normal(kw, (8, 1, 1, 1), dtype=jnp.float32) * 0.5
    bias = jax.random.normal(kb, (8,), dtype=jnp.float32) * 0.1

    out = conv1x1_pad1_leaky(x, weight, bias)
    jax.block_until_ready(out)

    # Plain-JAX reference (same math as the PyTorch module).
    x_pad = jnp.pad(x, ((0, 0), (0, 0), (1, 1), (1, 1)))
    v1 = x_pad * weight.reshape(1, 8, 1, 1) + bias.reshape(1, 8, 1, 1)
    ref = jnp.where(v1 > 0, v1, v1 * (-10.0))

    assert out.shape == (2, 8, 18, 18)
    assert jnp.allclose(out, ref, atol=1e-5, rtol=1e-5)
    print("KERNEL_OK")
</pallas_src>

<mosaic_0001>
module attributes {stable_mosaic.version = 11 : i64} {
  func.func @_conv1x1_pad1_leaky_kernel(%arg0: i32, %arg1: memref<1x1x16x16xf32, #tpu.memory_space<vmem>>, %arg2: memref<8x1xf32, #tpu.memory_space<vmem>>, %arg3: memref<8x1xf32, #tpu.memory_space<vmem>>, %arg4: memref<1x8x18x18xf32, #tpu.memory_space<vmem>>) attributes {dimension_semantics = [#tpu.dimension_semantics<parallel>], iteration_bounds = array<i64: 2>, scalar_prefetch = 0 : i64, scratch_operands = 0 : i64, tpu.core_type = #tpu.core_type<tc>, window_params = [{transform_indices = @transform_0, window_bounds = array<i64: 1, 1, 16, 16>}, {pipeline_mode = #tpu.pipeline_mode<synchronous>, transform_indices = @transform_1, window_bounds = array<i64: 8, 1>}, {pipeline_mode = #tpu.pipeline_mode<synchronous>, transform_indices = @transform_2, window_bounds = array<i64: 8, 1>}, {transform_indices = @transform_3, window_bounds = array<i64: 1, 8, 18, 18>}]} {
    %c0 = arith.constant 0 : index
    %c0_0 = arith.constant 0 : index
    %0 = vector.load %arg2[%c0, %c0_0] : memref<8x1xf32, #tpu.memory_space<vmem>>, vector<8x1xf32>
    %1 = vector.shape_cast %0 : vector<8x1xf32> to vector<1x8x1x1xf32>
    %c0_1 = arith.constant 0 : index
    %c0_2 = arith.constant 0 : index
    %2 = vector.load %arg3[%c0_1, %c0_2] : memref<8x1xf32, #tpu.memory_space<vmem>>, vector<8x1xf32>
    %3 = vector.shape_cast %2 : vector<8x1xf32> to vector<1x8x1x1xf32>
    %cst = arith.constant 0.000000e+00 : f32
    %4 = vector.broadcast %cst : f32 to vector<1x8x1x1xf32>
    %5 = arith.cmpf ogt, %3, %4 : vector<1x8x1x1xf32>
    %cst_3 = arith.constant -1.000000e+01 : f32
    %6 = vector.broadcast %cst_3 : f32 to vector<1x8x1x1xf32>
    %7 = arith.mulf %3, %6 : vector<1x8x1x1xf32>
    %8 = arith.select %5, %3, %7 : vector<1x8x1x1xi1>, vector<1x8x1x1xf32>
    %9 = vector.shape_cast %8 : vector<1x8x1x1xf32> to vector<1x8x1x1xf32>
    %10 = vector.broadcast %9 : vector<1x8x1x1xf32> to vector<1x8x18x18xf32>
    %c0_4 = arith.constant 0 : index
    %c0_5 = arith.constant 0 : index
    %c0_6 = arith.constant 0 : index
    %c0_7 = arith.constant 0 : index
    %11 = vector.load %arg4[%c0_4, %c0_5, %c0_6, %c0_7] : memref<1x8x18x18xf32, #tpu.memory_space<vmem>>, vector<1x8x18x18xf32>
    tpu.vector_store %arg4[%c0_4, %c0_5, %c0_6, %c0_7], %10 {strides = array<i32>} : memref<1x8x18x18xf32, #tpu.memory_space<vmem>>, vector<1x8x18x18xf32>,
    %c0_8 = arith.constant 0 : index
    %c0_9 = arith.constant 0 : index
    %c0_10 = arith.constant 0 : index
    %c0_11 = arith.constant 0 : index
    %12 = vector.load %arg1[%c0_8, %c0_9, %c0_10, %c0_11] : memref<1x1x16x16xf32, #tpu.memory_space<vmem>>, vector<1x1x16x16xf32>
    %13 = vector.shape_cast %12 : vector<1x1x16x16xf32> to vector<1x16x16xf32>
    %14 = vector.shape_cast %13 : vector<1x16x16xf32> to vector<1x1x16x16xf32>
    %15 = vector.broadcast %14 : vector<1x1x16x16xf32> to vector<1x8x16x16xf32>
    %16 = vector.broadcast %1 : vector<1x8x1x1xf32> to vector<1x8x16x16xf32>
    %17 = arith.mulf %15, %16 : vector<1x8x16x16xf32>
    %18 = vector.broadcast %3 : vector<1x8x1x1xf32> to vector<1x8x16x16xf32>
    %19 = arith.addf %17, %18 : vector<1x8x16x16xf32>
    %cst_12 = arith.constant 0.000000e+00 : f32
    %20 = vector.broadcast %cst_12 : f32 to vector<1x8x16x16xf32>
    %21 = arith.cmpf ogt, %19, %20 : vector<1x8x16x16xf32>
    %cst_13 = arith.constant -1.000000e+01 : f32
    %22 = vector.broadcast %cst_13 : f32 to vector<1x8x16x16xf32>
    %23 = arith.mulf %19, %22 : vector<1x8x16x16xf32>
    %24 = arith.select %21, %19, %23 : vector<1x8x16x16xi1>, vector<1x8x16x16xf32>
    %c0_14 = arith.constant 0 : index
    %c0_15 = arith.constant 0 : index
    %c1 = arith.constant 1 : index
    %c1_16 = arith.constant 1 : index
    %25 = vector.load %arg4[%c0_14, %c0_15, %c1, %c1_16] : memref<1x8x18x18xf32, #tpu.memory_space<vmem>>, vector<1x8x16x16xf32>
    tpu.vector_store %arg4[%c0_14, %c0_15, %c1, %c1_16], %24 {strides = array<i32>} : memref<1x8x18x18xf32, #tpu.memory_space<vmem>>, vector<1x8x16x16xf32>,
    return
  }
  func.func @transform_0(%arg0: i32) -> (i32, i32, i32, i32) {
    %c0_i32 = arith.constant 0 : i32
    %c0_i32_0 = arith.constant 0 : i32
    %c0_i32_1 = arith.constant 0 : i32
    %c0_i32_2 = arith.constant 0 : i32
    return %arg0, %c0_i32, %c0_i32_0, %c0_i32_1 : i32, i32, i32, i32
  }
  func.func @transform_1(%arg0: i32) -> (i32, i32) {
    %c0_i32 = arith.constant 0 : i32
    %c0_i32_0 = arith.constant 0 : i32
    %c0_i32_1 = arith.constant 0 : i32
    return %c0_i32, %c0_i32_0 : i32, i32
  }
  func.func @transform_2(%arg0: i32) -> (i32, i32) {
    %c0_i32 = arith.constant 0 : i32
    %c0_i32_0 = arith.constant 0 : i32
    %c0_i32_1 = arith.constant 0 : i32
    return %c0_i32, %c0_i32_0 : i32, i32
  }
  func.func @transform_3(%arg0: i32) -> (i32, i32, i32, i32) {
    %c0_i32 = arith.constant 0 : i32
    %c0_i32_0 = arith.constant 0 : i32
    %c0_i32_1 = arith.constant 0 : i32
    %c0_i32_2 = arith.constant 0 : i32
    return %arg0, %c0_i32, %c0_i32_0, %c0_i32_1 : i32, i32, i32, i32
  }
}

</mosaic_0001>

<bundles_post_ra>
// kernel: tpu_custom_call.1
= control target key start
LH: loop header
LB: loop body
LE: loop exit
PB: predicated region body
PF: predicated region fallthrough
CT: control target
= control target key end

     0   :  { %8 = vsyncpa [#allocation3], 0  ;;  %s1202_s0 = inlined_call_operand.hbm [shape: f32[2,1,16,16], index: 0, kind: input, shape index: {}]   ;;  %s1203_s1 = inlined_call_operand.vmem [shape: f32[8,1], index: 1, kind: input, shape index: {}]   ;;  %s1204_s2 = inlined_call_operand.vmem [shape: f32[8,1], index: 2, kind: input, shape index: {}]   ;;  %s1205_s3 = inlined_call_operand.vmem [shape: f32[2,8,18,18], index: 3, kind: output, shape index: {}]  }
   0x1   :  { %10 = vsyncpa [#allocation3 + $0x1], 0  ;;  %s934_s12 = smov 0   ;;  %s936_s13 = smov 0  }
   0x2   :  { %s938_s14 = smov 0   ;;  %s940_s15 = smov 0  }
   0x3 LB: > { %s953_s16 = sadd.s32 4294967295, %s906_s15   ;;  %s956_s17 = sadd.s32 1, %s906_s15   ;;  %s906_s15 = sphi %s940_s15, %s1212_s15   ;;  %s902_s14 = sphi %s938_s14, %s1211_s14   ;;  %s898_s13 = sphi %s936_s13, %s1210_s13   ;;  %s894_s12 = sphi %s934_s12, %s1209_s12  }
   0x4   : > { %s20_s18 = ssub.s32 %s906_s15, %s956_s17  ;;  %s23_s19 = sadd.s32 1, %s902_s14 }
   0x5   : > { %p21_p0 = scmp.eq.s32.totalorder %s20_s18, 0  ;;  %p30_p1 = scmp.ne.s32.totalorder %s902_s14, %s898_s13 }
   0x6   : > { %p31_p2 = scmp.eq.s32.totalorder %s906_s15, 0  ;;  %p36_p3 = scmp.ne.s32.totalorder %s898_s13, %s894_s12 }
   0x7   : > { %s966_s20 = scalar_select %p21_p0, %s902_s14, %s23_s19  }
   0x8   : > { %p32_p4 = por %p31_p2, %p30_p1  ;;  %p37_p5 = scmp.eq.s32.totalorder %s953_s16, 0 }
   0x9   : > { %p800_p6 = scmp.lt.s32.totalorder %s906_s15, 2  ;;  %s134_s22 = sand.u32 1, %s902_s14  }
   0xa   : > { %p970_p7 = por %p37_p5, %p36_p3  ;;  %s784_s23 = sshll.u32 %s134_s22, 4 }
   0xb   : > { %s792_s24 = sshll.u32 %s906_s15, 8  ;;  %s138_s28 = scalar_lea.vmem [#allocation2], %s784_s23 }
   0xc   : > { %s979_s27 = scalar_lea.hbm %s1202_s0, %s792_s24  ;;  %s145_s29 = sshll.u32 %s138_s28, 4  ;;  %s981_s29 = int_to_ptr.vmem [resolvable:$true] %s145_s29 }
   0xd   : > { %p983_p8 = pnand %p800_p6, %p32_p4  ;;  %s988_s4 = scalar_lea.sflag [#allocation3], %s134_s22 }
   0xe   : > { %s842_s5 = scalar_lea.hbm %s979_s27, 256  ;;  %s847_s8 = scalar_lea.hbm %s1202_s0, 512 }
   0xf   : > { %p843_p10 = scmp.ne.s32.totalorder %s979_s27, %s842_s5  ;;  %p844_p11 = pneg %p983_p8 }
  0x10   : > { %p848_p0 = scmp.lt.u32.totalorder %s979_s27, %s1202_s0  ;;  %p849_p1 = scmp.lt.u32.totalorder %s847_s8, %s842_s5 }
  0x11   : > { %p845_p12 = pnand %p844_p11, %p843_p10  ;;  %p851_p3 = scmp.lt.u32.totalorder %s842_s5, %s979_s27 }
  0x12   : > { %p850_p2 = por %p849_p1, %p848_p0 }
  0x13   : > { %p846_p13 = pneg %p845_p12 }
  0x14   : > { %p852_p4 = por %p851_p3, %p850_p2 }
  0x16   : > { %p853_p5 = pnand %p852_p4, %p846_p13 }
  0x18   : > { %856 = shalt.err (!%p853_p5)
}
  0x19   : > { %s857_s11 = scalar_lea.vmem %s981_s29, 256  ;;  %s908_s12 = smov [#allocation2]  }
  0x1a   : > { %p858_p6 = scmp.ne.s32.totalorder %s981_s29, %s857_s11  ;;  %s862_s18 = sshll.u32 %s908_s12, 4  ;;  %s863_s18 = int_to_ptr.vmem [resolvable:$false] %s862_s18 }
  0x1b   : > { %s864_s19 = scalar_lea.vmem %s863_s18, 512  ;;  %p865_p9 = scmp.lt.s32.totalorder %s981_s29, %s863_s18 }
  0x1c   : > { %p860_p10 = pnand %p858_p6, %p844_p11  ;;  %p866_p0 = scmp.lt.s32.totalorder %s864_s19, %s857_s11 }
  0x1e   : > { %p861_p12 = pneg %p860_p10  ;;  %p867_p1 = por %p866_p0, %p865_p9 }
  0x20   : > { %p868_p2 = pnand %p867_p1, %p861_p12 }
  0x22   : > { %871 = shalt.err (!%p868_p2)
}
  0x23   : > { %s909_s22 = smov 128   ;;  %s910_s23 = smov 8  }
  0x24   : > { %799 = dma.hbm_to_vmem [thread:$0]  (!%p983_p8), %s979_s27, 256, %s981_s29, %s988_s4, %s909_s22, %s909_s22, %s910_s23  }
  0x25   : > { %p153_p11 = scmp.lt.s32.totalorder %s906_s15, 3  ;;  %p1208_p13 = scmp.ge.s32.totalorder %s906_s15, 1 }
  0x27   : > { %p154_p3 = pnand %p1208_p13, %p153_p11 }
  0x28   : > { %s159_s24 = sand.u32 (!%p154_p3), 1, %s898_s13  }
  0x29   : > { %157 = sbr.rel (%p154_p3) target bundleno = 351 (0x15f), region = 32  ;;  %s1020_s25 = sshll.u32 (!%p154_p3), %s159_s24, 4 }
  0x2a   : > { %s160_s26 = scalar_lea.sflag (!%p154_p3), [#allocation3], %s159_s24  ;;  %s163_s28 = scalar_lea.vmem (!%p154_p3), [#allocation2], %s1020_s25 }
  0x30   : > { %889 = dma.done.wait (%p970_p7), %s160_s26, 256  }
  0x31   : > { %891 = vsyncadd (%p970_p7), %s160_s26, 4294967040  ;;  %v197_v0 = vlaneseq  ;;  %v911_v1 = vmov 0   ;;  %v912_v2 = vmov 1966171168   ;;  %v191_v7 = vld [vmem:[%s1203_s1] sm:$0xff]  ;;  %s913_s21 = smov 1  }
  0x32   : > { %838 = vset.pattern.permute.xlu0 %v911_v1  ;;  %v195_v3 = vunpack.c.l.s4 %v912_v2  ;;  %839 = vset.pattern.permute.xlu1 %v911_v1  ;;  %v242_v8 = vld [vmem:[%s1204_s2] sm:$0xff]  ;;  %v193_v11 = vcombine.high %v191_v7, %v191_v7  ;;  %p186_p7 = scmp.lt.s32.totalorder %s953_s16, 1 }
  0x33   : > { %v198_v4 = vshrl.u32 %v197_v0, 7  ;;  %v244_v31 = vcombine.high %v242_v8, %v242_v8 }
  0x34   : > { %v196_v5 = vunpack.c.0.s8 %v195_v3  ;;  %s1214_s16 = smov (!%p186_p7, %s953_s16), 1 }
  0x35   : > { %v1033_v10 = vsub.s32 0, %v198_v4  ;;  %s793_s4 = smul.u32 192, %s1214_s16 }
  0x36   : > { %v199_v6 = vsub.s32 %v196_v5, %v198_v4 }
  0x37   : > { %s1094_s6 = scalar_lea.vmem %s1205_s3, %s793_s4 }
  0x38   : > { %v200_v9 = vrot.slane %v191_v7, %v199_v6  ;;  %v251_v12 = vrot.slane %v242_v8, %v199_v6  ;;  %v207_v20 = vrot.slane %v193_v11, %v199_v6  ;;  %v258_v36 = vrot.slane %v244_v31, %v199_v6 }
  0x3a   : > { %v216_v13 = vrot.slane %v200_v9, %v199_v6  ;;  %v208_v14 = vcombine.high %v200_v9, %v200_v9  ;;  %v267_v15 = vrot.slane %v251_v12, %v199_v6  ;;  %v259_v16 = vcombine.high %v251_v12, %v251_v12 }
  0x3b   : > { %v209_v26 = vcombine.high %v207_v20, %v207_v20  ;;  %v223_v28 = vrot.slane %v207_v20, %v199_v6  ;;  %v260_v41 = vcombine.high %v258_v36, %v258_v36  ;;  %v274_v43 = vrot.slane %v258_v36, %v199_v6 }
  0x3c   : > { %v428_v17 = vrot.slane %v216_v13, %v1033_v10  ;;  %v238_v18 = vcombine.high %v216_v13, %v216_v13  ;;  %v281_v19 = vrot.slane %v259_v16, %v199_v6  ;;  %v230_v21 = vrot.slane %v208_v14, %v199_v6  ;;  %v1061_v13 = vld [vmem:[%s163_s28] sm:$0xff]  ;;  %v1065_v14 = vld [vmem:[%s163_s28 + $0x8] sm:$0xff] }
  0x3d   : > { %v508_v23 = vrot.slane %v267_v15, %v1033_v10  ;;  %v237_v30 = vrot.slane %v209_v26, %v199_v6  ;;  %v444_v32 = vrot.slane %v223_v28, %v1033_v10  ;;  %v239_v33 = vcombine.high %v223_v28, %v223_v28 }
  0x3e   : > { %458 = vperm.xlu0 %838, %v428_v17   ;;  %v436_v22 = vrot.slane %v238_v18, %v1033_v10  ;;  %v512_v24 = vrot.slane %v281_v19, %v1033_v10  ;;  %v240_v25 = vcombine.high %v230_v21, %v230_v21  ;;  %v432_v27 = vrot.slane %v230_v21, %v1033_v10 }
  0x3f   : > { %v448_v34 = vrot.slane %v237_v30, %v1033_v10  ;;  %v291_v35 = vcombine.high %v281_v19, %v281_v19  ;;  %v452_v37 = vrot.slane %v239_v33, %v1033_v10  ;;  %v289_v38 = vcombine.high %v267_v15, %v267_v15 }
  0x40   : > { %466 = vperm.xlu1 %839, %v436_v22   ;;  %v440_v29 = vrot.slane %v240_v25, %v1033_v10  ;;  %v241_v40 = vcombine.high %v237_v30, %v237_v30  ;;  %v288_v45 = vrot.slane %v260_v41, %v199_v6  ;;  %v524_v46 = vrot.slane %v274_v43, %v1033_v10 }
  0x41   : > { %v520_v39 = vrot.slane %v291_v35, %v1033_v10  ;;  %v516_v42 = vrot.slane %v289_v38, %v1033_v10  ;;  %v290_v47 = vcombine.high %v274_v43, %v274_v43  ;;  %v309_v48 = vmul.f32 -10.0, %v267_v15 }
  0x42   : > { %538 = vperm.xlu0 %838, %v508_v23   ;;  %v456_v44 = vrot.slane %v241_v40, %v1033_v10  ;;  %v528_v49 = vrot.slane %v288_v45, %v1033_v10  ;;  %v292_v50 = vcombine.high %v288_v45, %v288_v45  ;;  %vm301_vm0 = vcmp.gt.f32.partialorder %v267_v15, 0.0 }
  0x43   : > { %v310_v51 = vmul.f32 -10.0, %v281_v19  ;;  %v532_v52 = vrot.slane %v290_v47, %v1033_v10  ;;  %vm302_vm1 = vcmp.gt.f32.partialorder %v281_v19, 0.0  ;;  %v317_v53 = vsel %vm301_vm0, %v267_v15, %v309_v48 }
  0x44   : > { %542 = vperm.xlu1 %839, %v512_v24   ;;  %v311_v54 = vmul.f32 -10.0, %v289_v38  ;;  %v536_v55 = vrot.slane %v292_v50, %v1033_v10  ;;  %vm303_vm2 = vcmp.gt.f32.partialorder %v289_v38, 0.0  ;;  %v312_v57 = vmul.f32 -10.0, %v291_v35 }
  0x45   : > { %v318_v56 = vsel %vm302_vm1, %v281_v19, %v310_v51  ;;  %v336_v58 = vrot.slane %v317_v53, %v1033_v10  ;;  %vm304_vm3 = vcmp.gt.f32.partialorder %v291_v35, 0.0  ;;  %v313_v60 = vmul.f32 -10.0, %v274_v43 }
  0x46   : > { %462 = vperm.xlu0 %838, %v432_v27   ;;  %v319_v59 = vsel %vm303_vm2, %v289_v38, %v311_v54  ;;  %v340_v61 = vrot.slane %v318_v56, %v1033_v10  ;;  %vm305_vm4 = vcmp.gt.f32.partialorder %v274_v43, 0.0  ;;  %v320_v62 = vsel %vm304_vm3, %v291_v35, %v312_v57 }
  0x47   : > { %v314_v63 = vmul.f32 -10.0, %v288_v45  ;;  %v344_v0 = vrot.slane %v319_v59, %v1033_v10  ;;  %vm306_vm5 = vcmp.gt.f32.partialorder %v288_v45, 0.0  ;;  %v321_v1 = vsel %vm305_vm4, %v274_v43, %v313_v60 }
  0x48   : > { %470 = vperm.xlu1 %839, %v440_v29   ;;  %v315_v2 = vmul.f32 -10.0, %v290_v47  ;;  %v348_v3 = vrot.slane %v320_v62, %v1033_v10  ;;  %vm307_vm6 = vcmp.gt.f32.partialorder %v290_v47, 0.0  ;;  %v316_v5 = vmul.f32 -10.0, %v292_v50 }
  0x49   : > { %v322_v4 = vsel %vm306_vm5, %v288_v45, %v314_v63  ;;  %v352_v6 = vrot.slane %v321_v1, %v1033_v10  ;;  %vm308_vm7 = vcmp.gt.f32.partialorder %v292_v50, 0.0  ;;  %vm397_vm0 = vcmask 146432  }
  0x4a   : > { %474 = vperm.xlu0 %838, %v444_v32   ;;  %v323_v7 = vsel %vm307_vm6, %v290_v47, %v315_v2  ;;  %v356_v8 = vrot.slane %v322_v4, %v1033_v10  ;;  %v324_v9 = vsel %vm308_vm7, %v292_v50, %v316_v5  ;;  %vm400_vm1 = vcmask 140288  }
  0x4b   : > { %v360_v11 = vrot.slane %v323_v7, %v1033_v10  ;;  %v364_v12 = vrot.slane %v324_v9, %v1033_v10 }
  0x4c   : > { %478 = vperm.xlu1 %839, %v448_v34  }
  0x4e   : > { %482 = vperm.xlu0 %838, %v452_v37  }
  0x50   : > { %550 = vperm.xlu1 %839, %v520_v39  }
  0x52   : > { %546 = vperm.xlu0 %838, %v516_v42  }
  0x54   : > { %486 = vperm.xlu1 %839, %v456_v44  }
  0x56   : > { %554 = vperm.xlu0 %838, %v524_v46  }
  0x58   : > { %558 = vperm.xlu1 %839, %v528_v49  }
  0x5a   : > { %562 = vperm.xlu0 %838, %v532_v52  }
  0x5c   : > { %566 = vperm.xlu1 %839, %v536_v55  }
  0x5e   : > { %366 = vperm.xlu0 %838, %v336_v58  }
  0x60   : > { %370 = vperm.xlu1 %839, %v340_v61  }
  0x62   : > { %374 = vperm.xlu0 %838, %v344_v0  }
  0x64   : > { %378 = vperm.xlu1 %839, %v348_v3  }
  0x66   : > { %382 = vperm.xlu0 %838, %v352_v6  }
  0x68   : > { %386 = vperm.xlu1 %839, %v356_v8  }
  0x6a   : > { %390 = vperm.xlu0 %838, %v360_v11  }
  0x6c   : > { %394 = vperm.xlu1 %839, %v364_v12  }
  0xbd   : > { %v459_v15 = vpop.permute.xlu0 %458 }
  0xbe   : > { %v489_v17 = vmul.f32 %v459_v15, %v1061_v13  ;;  %v490_v18 = vmul.f32 %v459_v15, %v1065_v14 }
  0xbf   : > { %v467_v16 = vpop.permute.xlu1 %466 }
  0xc0   : > { %v493_v40 = vmul.f32 %v467_v16, %v1061_v13  ;;  %v494_v41 = vmul.f32 %v467_v16, %v1065_v14 }
  0xc1   : > { %v539_v19 = vpop.permute.xlu0 %538 }
  0xc2   : > { %v569_v20 = vadd.f32 %v539_v19, %v489_v17  ;;  %v570_v21 = vadd.f32 %v539_v19, %v490_v18 }
  0xc3   : > { %v543_v22 = vpop.permute.xlu1 %542 }
  0xc4   : > { %vm585_vm8 = vcmp.gt.f32.partialorder %v569_v20, 0.0  ;;  %v601_v10 = vmul.f32 -10.0, %v569_v20  ;;  %vm586_vm9 = vcmp.gt.f32.partialorder %v570_v21, 0.0  ;;  %v602_v23 = vmul.f32 -10.0, %v570_v21 }
  0xc5   : > { %v463_v24 = vpop.permute.xlu0 %462 }
  0xc6   : > { %v491_v25 = vmul.f32 %v463_v24, %v1061_v13  ;;  %v492_v26 = vmul.f32 %v463_v24, %v1065_v14  ;;  %v617_v27 = vsel %vm585_vm8, %v569_v20, %v601_v10  ;;  %v618_v28 = vsel %vm586_vm9, %v570_v21, %v602_v23 }
  0xc7   : > { %v471_v29 = vpop.permute.xlu1 %470  ;;  %649 = vrot.lane.b32.xlu0 %v617_v27, %s913_s21  ;;  %651 = vrot.lane.b32.xlu1 %v618_v28, %s913_s21 }
  0xc8   : > { %v571_v30 = vadd.f32 %v543_v22, %v491_v25  ;;  %v572_v31 = vadd.f32 %v543_v22, %v492_v26  ;;  %v495_v45 = vmul.f32 %v471_v29, %v1061_v13  ;;  %v496_v50 = vmul.f32 %v471_v29, %v1065_v14 }
  0xc9   : > { %v475_v32 = vpop.permute.xlu0 %474 }
  0xca   : > { %vm587_vm10 = vcmp.gt.f32.partialorder %v571_v30, 0.0  ;;  %v603_v33 = vmul.f32 -10.0, %v571_v30  ;;  %vm588_vm11 = vcmp.gt.f32.partialorder %v572_v31, 0.0  ;;  %v604_v35 = vmul.f32 -10.0, %v572_v31 }
  0xcb   : > { %v479_v34 = vpop.permute.xlu1 %478  ;;  %v497_v47 = vmul.f32 %v475_v32, %v1061_v13  ;;  %v498_v48 = vmul.f32 %v475_v32, %v1065_v14 }
  0xcc   : > { %v619_v36 = vsel %vm587_vm10, %v571_v30, %v603_v33  ;;  %v620_v38 = vsel %vm588_vm11, %v572_v31, %v604_v35  ;;  %v499_v60 = vmul.f32 %v479_v34, %v1061_v13  ;;  %v500_v62 = vmul.f32 %v479_v34, %v1065_v14 }
  0xcd   : > { %653 = vrot.lane.b32.xlu0 %v619_v36, %s913_s21  ;;  %v483_v37 = vpop.permute.xlu0 %482  ;;  %655 = vrot.lane.b32.xlu1 %v620_v38, %s913_s21  ;;  %vm697_vm10 = vcmask 138248  }
  0xce   : > { %v501_v8 = vmul.f32 %v483_v37, %v1061_v13  ;;  %v502_v9 = vmul.f32 %v483_v37, %v1065_v14 }
  0xcf   : > { %v551_v39 = vpop.permute.xlu1 %550 }
  0xd0   : > { %v575_v53 = vadd.f32 %v551_v39, %v495_v45  ;;  %v576_v57 = vadd.f32 %v551_v39, %v496_v50 }
  0xd1   : > { %v547_v42 = vpop.permute.xlu0 %546 }
  0xd2   : > { %v573_v43 = vadd.f32 %v547_v42, %v493_v40  ;;  %v574_v44 = vadd.f32 %v547_v42, %v494_v41  ;;  %v607_v3 = vmul.f32 -10.0, %v575_v53  ;;  %vm591_vm2 = vcmp.gt.f32.partialorder %v575_v53, 0.0 }
  0xd3   : > { %v487_v46 = vpop.permute.xlu1 %486  ;;  %v608_v7 = vmul.f32 -10.0, %v576_v57  ;;  %vm592_vm3 = vcmp.gt.f32.partialorder %v576_v57, 0.0 }
  0xd4   : > { %vm589_vm12 = vcmp.gt.f32.partialorder %v573_v43, 0.0  ;;  %v605_v49 = vmul.f32 -10.0, %v573_v43  ;;  %vm590_vm13 = vcmp.gt.f32.partialorder %v574_v44, 0.0  ;;  %v606_v52 = vmul.f32 -10.0, %v574_v44 }
  0xd5   : > { %v555_v51 = vpop.permute.xlu0 %554  ;;  %v623_v15 = vsel %vm591_vm2, %v575_v53, %v607_v3  ;;  %v624_v18 = vsel %vm592_vm3, %v576_v57, %v608_v7  ;;  %v503_v21 = vmul.f32 %v487_v46, %v1061_v13  ;;  %v504_v22 = vmul.f32 %v487_v46, %v1065_v14 }
  0xd6   : > { %v577_v54 = vadd.f32 %v555_v51, %v497_v47  ;;  %v578_v55 = vadd.f32 %v555_v51, %v498_v48  ;;  %v621_v56 = vsel %vm589_vm12, %v573_v43, %v605_v49  ;;  %v622_v58 = vsel %vm590_vm13, %v574_v44, %v606_v52 }
  0xd7   : > { %657 = vrot.lane.b32.xlu0 %v621_v56, %s913_s21  ;;  %v559_v59 = vpop.permute.xlu1 %558  ;;  %659 = vrot.lane.b32.xlu1 %v622_v58, %s913_s21 }
  0xd8   : > { %vm593_vm14 = vcmp.gt.f32.partialorder %v577_v54, 0.0  ;;  %v609_v61 = vmul.f32 -10.0, %v577_v54  ;;  %vm594_vm15 = vcmp.gt.f32.partialorder %v578_v55, 0.0  ;;  %v610_v0 = vmul.f32 -10.0, %v578_v55 }
  0xd9   : > { %v563_v63 = vpop.permute.xlu0 %562  ;;  %v579_v1 = vadd.f32 %v559_v59, %v499_v60  ;;  %v580_v4 = vadd.f32 %v559_v59, %v500_v62 }
  0xda   : > { %v625_v2 = vsel %vm593_vm14, %v577_v54, %v609_v61  ;;  %v626_v5 = vsel %vm594_vm15, %v578_v55, %v610_v0  ;;  %v581_v12 = vadd.f32 %v563_v63, %v501_v8  ;;  %v582_v17 = vadd.f32 %v563_v63, %v502_v9 }
  0xdb   : > { %665 = vrot.lane.b32.xlu0 %v625_v2, %s913_s21  ;;  %v567_v6 = vpop.permute.xlu1 %566  ;;  %667 = vrot.lane.b32.xlu1 %v626_v5, %s913_s21  ;;  %v611_v16 = vmul.f32 -10.0, %v579_v1  ;;  %v612_v20 = vmul.f32 -10.0, %v580_v4  ;;  %vm595_vm4 = vcmp.gt.f32.partialorder %v579_v1, 0.0  ;;  %vm596_vm5 = vcmp.gt.f32.partialorder %v580_v4, 0.0 }
  0xdc   : > { %v583_v23 = vadd.f32 %v567_v6, %v503_v21  ;;  %v613_v24 = vmul.f32 -10.0, %v581_v12  ;;  %v584_v25 = vadd.f32 %v567_v6, %v504_v22  ;;  %v614_v27 = vmul.f32 -10.0, %v582_v17 }
  0xdd   : > { %v367_v11 = vpop.permute.xlu0 %366  ;;  %v627_v13 = vsel %vm595_vm4, %v579_v1, %v611_v16  ;;  %v628_v26 = vsel %vm596_vm5, %v580_v4, %v612_v20  ;;  %vm597_vm6 = vcmp.gt.f32.partialorder %v581_v12, 0.0  ;;  %vm598_vm7 = vcmp.gt.f32.partialorder %v582_v17, 0.0 }
  0xde   : > { %398 = vst.msk [vmem:[%s1094_s6] sm:$0xff] %vm397_vm0, %v367_v11  ;;  %399 = vst.msk [vmem:[%s1094_s6 + $0x8] sm:$0xff] %vm397_vm0, %v367_v11  ;;  %v629_v29 = vsel %vm597_vm6, %v581_v12, %v613_v24  ;;  %v615_v30 = vmul.f32 -10.0, %v583_v23  ;;  %v630_v31 = vsel %vm598_vm7, %v582_v17, %v614_v27  ;;  %v616_v33 = vmul.f32 -10.0, %v584_v25 }
  0xdf   : > { %401 = vst.msk [vmem:[%s1094_s6 + $0x10] sm:$0x3] %vm400_vm1, %v367_v11  ;;  %661 = vrot.lane.b32.xlu0 %v623_v15, %s913_s21  ;;  %v371_v19 = vpop.permute.xlu1 %370  ;;  %663 = vrot.lane.b32.xlu1 %v624_v18, %s913_s21  ;;  %vm599_vm8 = vcmp.gt.f32.partialorder %v583_v23, 0.0  ;;  %vm600_vm9 = vcmp.gt.f32.partialorder %v584_v25, 0.0 }
  0xe0   : > { %402 = vst.msk [vmem:[%s1094_s6 + $0x18] sm:$0xff] %vm397_vm0, %v371_v19  ;;  %403 = vst.msk [vmem:[%s1094_s6 + $0x20] sm:$0xff] %vm397_vm0, %v371_v19  ;;  %v631_v35 = vsel %vm599_vm8, %v583_v23, %v615_v30  ;;  %v632_v36 = vsel %vm600_vm9, %v584_v25, %v616_v33 }
  0xe1   : > { %404 = vst.msk [vmem:[%s1094_s6 + $0x28] sm:$0x3] %vm400_vm1, %v371_v19  ;;  %v375_v10 = vpop.permute.xlu0 %374 }
  0xe2   : > { %405 = vst.msk [vmem:[%s1094_s6 + $0x30] sm:$0xff] %vm397_vm0, %v375_v10  ;;  %406 = vst.msk [vmem:[%s1094_s6 + $0x38] sm:$0xff] %vm397_vm0, %v375_v10 }
  0xe3   : > { %407 = vst.msk [vmem:[%s1094_s6 + $0x40] sm:$0x3] %vm400_vm1, %v375_v10  ;;  %669 = vrot.lane.b32.xlu0 %v627_v13, %s913_s21  ;;  %v379_v14 = vpop.permute.xlu1 %378  ;;  %671 = vrot.lane.b32.xlu1 %v628_v26, %s913_s21 }
  0xe4   : > { %408 = vst.msk [vmem:[%s1094_s6 + $0x48] sm:$0xff] %vm397_vm0, %v379_v14  ;;  %409 = vst.msk [vmem:[%s1094_s6 + $0x50] sm:$0xff] %vm397_vm0, %v379_v14 }
  0xe5   : > { %410 = vst.msk [vmem:[%s1094_s6 + $0x58] sm:$0x3] %vm400_vm1, %v379_v14  ;;  %v383_v28 = vpop.permute.xlu0 %382 }
  0xe6   : > { %411 = vst.msk [vmem:[%s1094_s6 + $0x60] sm:$0xff] %vm397_vm0, %v383_v28  ;;  %412 = vst.msk [vmem:[%s1094_s6 + $0x68] sm:$0xff] %vm397_vm0, %v383_v28 }
  0xe7   : > { %413 = vst.msk [vmem:[%s1094_s6 + $0x70] sm:$0x3] %vm400_vm1, %v383_v28  ;;  %673 = vrot.lane.b32.xlu0 %v629_v29, %s913_s21  ;;  %v387_v32 = vpop.permute.xlu1 %386  ;;  %675 = vrot.lane.b32.xlu1 %v630_v31, %s913_s21 }
  0xe8   : > { %414 = vst.msk [vmem:[%s1094_s6 + $0x78] sm:$0xff] %vm397_vm0, %v387_v32  ;;  %415 = vst.msk [vmem:[%s1094_s6 + $0x80] sm:$0xff] %vm397_vm0, %v387_v32 }
  0xe9   : > { %416 = vst.msk [vmem:[%s1094_s6 + $0x88] sm:$0x3] %vm400_vm1, %v387_v32  ;;  %v391_v34 = vpop.permute.xlu0 %390 }
  0xea   : > { %417 = vst.msk [vmem:[%s1094_s6 + $0x90] sm:$0xff] %vm397_vm0, %v391_v34  ;;  %418 = vst.msk [vmem:[%s1094_s6 + $0x98] sm:$0xff] %vm397_vm0, %v391_v34 }
  0xeb   : > { %419 = vst.msk [vmem:[%s1094_s6 + $0xa0] sm:$0x3] %vm400_vm1, %v391_v34  ;;  %677 = vrot.lane.b32.xlu0 %v631_v35, %s913_s21  ;;  %v395_v37 = vpop.permute.xlu1 %394  ;;  %679 = vrot.lane.b32.xlu1 %v632_v36, %s913_s21 }
  0xec   : > { %420 = vst.msk [vmem:[%s1094_s6 + $0xa8] sm:$0xff] %vm397_vm0, %v395_v37  ;;  %421 = vst.msk [vmem:[%s1094_s6 + $0xb0] sm:$0xff] %vm397_vm0, %v395_v37 }
  0xed   : > { %422 = vst.msk [vmem:[%s1094_s6 + $0xb8] sm:$0x3] %vm400_vm1, %v395_v37 }
 0x139   : > { %v650_v38 = vpop.permute.xlu0 %649  ;;  %v652_v39 = vpop.permute.xlu1 %651 }
 0x13a   : > { %698 = vst.msk [vmem:[%s1094_s6 + $0x1] sm:$0xff] %vm697_vm10, %v650_v38  ;;  %699 = vst.msk [vmem:[%s1094_s6 + $0x9] sm:$0xff] %vm697_vm10, %v652_v39 }
 0x13f   : > { %v654_v40 = vpop.permute.xlu0 %653  ;;  %v656_v41 = vpop.permute.xlu1 %655 }
 0x140   : > { %700 = vst.msk [vmem:[%s1094_s6 + $0x19] sm:$0xff] %vm697_vm10, %v654_v40  ;;  %701 = vst.msk [vmem:[%s1094_s6 + $0x21] sm:$0xff] %vm697_vm10, %v656_v41 }
 0x149   : > { %v658_v42 = vpop.permute.xlu0 %657  ;;  %v660_v43 = vpop.permute.xlu1 %659 }
 0x14a   : > { %702 = vst.msk [vmem:[%s1094_s6 + $0x31] sm:$0xff] %vm697_vm10, %v658_v42  ;;  %703 = vst.msk [vmem:[%s1094_s6 + $0x39] sm:$0xff] %vm697_vm10, %v660_v43 }
 0x14d   : > { %v666_v44 = vpop.permute.xlu0 %665  ;;  %v668_v45 = vpop.permute.xlu1 %667 }
 0x14e   : > { %706 = vst.msk [vmem:[%s1094_s6 + $0x61] sm:$0xff] %vm697_vm10, %v666_v44  ;;  %707 = vst.msk [vmem:[%s1094_s6 + $0x69] sm:$0xff] %vm697_vm10, %v668_v45 }
 0x151   : > { %v662_v46 = vpop.permute.xlu0 %661  ;;  %v664_v47 = vpop.permute.xlu1 %663 }
 0x152   : > { %704 = vst.msk [vmem:[%s1094_s6 + $0x49] sm:$0xff] %vm697_vm10, %v662_v46  ;;  %705 = vst.msk [vmem:[%s1094_s6 + $0x51] sm:$0xff] %vm697_vm10, %v664_v47 }
 0x155   : > { %v670_v48 = vpop.permute.xlu0 %669  ;;  %v672_v49 = vpop.permute.xlu1 %671 }
 0x156   : > { %708 = vst.msk [vmem:[%s1094_s6 + $0x79] sm:$0xff] %vm697_vm10, %v670_v48  ;;  %709 = vst.msk [vmem:[%s1094_s6 + $0x81] sm:$0xff] %vm697_vm10, %v672_v49 }
 0x159   : > { %v674_v50 = vpop.permute.xlu0 %673  ;;  %v676_v51 = vpop.permute.xlu1 %675 }
 0x15a   : > { %710 = vst.msk [vmem:[%s1094_s6 + $0x91] sm:$0xff] %vm697_vm10, %v674_v50  ;;  %711 = vst.msk [vmem:[%s1094_s6 + $0x99] sm:$0xff] %vm697_vm10, %v676_v51 }
 0x15d   : > { %v678_v52 = vpop.permute.xlu0 %677  ;;  %v680_v53 = vpop.permute.xlu1 %679 }
 0x15e   : > { %712 = vst.msk [vmem:[%s1094_s6 + $0xa9] sm:$0xff] %vm697_vm10, %v678_v52  ;;  %713 = vst.msk [vmem:[%s1094_s6 + $0xb1] sm:$0xff] %vm697_vm10, %v680_v53 }
 0x15f PF: > { %p13_p8 = scmp.ge.s32.totalorder %s956_s17, 4   ;;  %s1209_s12 = smov %s898_s13 }
 0x160   : > { %s1210_s13 = smov %s902_s14  ;;  %s1211_s14 = smov %s966_s20 }
 0x161   : > { %s1212_s15 = smov %s956_s17  ;;  %15 = sbr.rel (!%p13_p8) target bundleno = 3 (0x3), region = 72 }
 0x168   :  { %735 = vsyncpa [#allocation3], 1 }
 0x169   :  { %737 = vsyncpa [#allocation3 + $0x1], 1 }

</bundles_post_ra>
